<compile_context>
chip_gen: v7x
topology: tpu7x:2x2x1
jax: 0.10.0
libtpu: 0.0.40
codegen_flags: <defaults>
</compile_context>

<pallas_src>
import jax
import jax.numpy as jnp
from jax.experimental import pallas as pl
from jax.experimental.pallas import tpu as pltpu

NEG_MASK = -1e30    # logit fill for non-edges
NEG_CLAMP = -1e25   # floor for the running max (keeps exp() of masked entries at exactly 0)


def _round_up(x, m):
    return ((x + m - 1) // m) * m


def _pad2(a, rows, cols):
    return jnp.pad(a, ((0, rows - a.shape[0]), (0, cols - a.shape[1])))


# --------------------------------------------------------------------------------------
# Prologue: per row-block compute h = x @ W (bf16 out) and attention scores (f32).
# --------------------------------------------------------------------------------------
def project_kernel(x_ref, w_ref, asrc_ref, adst_ref, h_ref, ssrc_ref, sdst_ref):
    h = jnp.dot(x_ref[...], w_ref[...], preferred_element_type=jnp.float32)   # [TQ, Hp]
    ssrc_ref[...] = jnp.sum(h * asrc_ref[...], axis=-1, keepdims=True)         # [TQ, 1]
    sdst_ref[...] = jnp.sum(h * adst_ref[...], axis=-1, keepdims=True)         # [TQ, 1]
    h_ref[...] = h.astype(jnp.bfloat16)


# --------------------------------------------------------------------------------------
# Main: masked online-softmax attention over source blocks + fused tanh + LSTM step.
# --------------------------------------------------------------------------------------
def attn_lstm_kernel(adj_ref, h_ref, sdst_ref, ssrc_ref, bias_ref, wih_ref,
                     out_ref, m_sc, l_sc, acc_sc):
    jk = pl.program_id(1)

    @pl.when(jk == 0)
    def _():
        m_sc[...] = jnp.full_like(m_sc, NEG_CLAMP)
        l_sc[...] = jnp.zeros_like(l_sc)
        acc_sc[...] = jnp.zeros_like(acc_sc)

    # attention logits for this (target-block, source-block) tile
    e = sdst_ref[...] + ssrc_ref[...]                          # [TQ,1] + [1,TK] -> [TQ,TK]
    e = jnp.where(e > 0, e, 0.2 * e)                           # LeakyReLU(0.2)
    maskf = adj_ref[...].astype(jnp.float32)                   # int8 -> f32
    logits = jnp.where(maskf > 0.0, e, jnp.float32(NEG_MASK))

    # online softmax, un-normalized accumulation (normalize once at the end)
    m_prev = m_sc[...]
    m_new = jnp.maximum(
        jnp.maximum(m_prev, jnp.max(logits, axis=-1, keepdims=True)),
        jnp.float32(NEG_CLAMP))
    a = jnp.exp(m_prev - m_new)
    p = jnp.exp(logits - m_new)                                # masked entries underflow to 0
    l_sc[...] = a * l_sc[...] + jnp.sum(p, axis=-1, keepdims=True)
    acc_sc[...] = a * acc_sc[...] + jnp.dot(
        p.astype(jnp.bfloat16), h_ref[...], preferred_element_type=jnp.float32)
    m_sc[...] = m_new

    @pl.when(jk == pl.num_programs(1) - 1)
    def _():
        inv_l = pl.reciprocal(jnp.maximum(l_sc[...], jnp.float32(1e-30)), approx=True)
        g = jnp.tanh(acc_sc[...] * inv_l + bias_ref[...])      # Breadth output, [TQ, Hp]

        # Depth: one bias-free LSTM step, h0 = c0 = 0  (forget gate dropped: f*c0 == 0)
        gates = jnp.dot(g.astype(jnp.bfloat16), wih_ref[...],
                        preferred_element_type=jnp.float32)    # [TQ, 3*Hp], gates i|g|o
        hp = acc_sc.shape[-1]
        i_g = jax.nn.sigmoid(gates[:, 0 * hp:1 * hp])
        g_g = jnp.tanh(gates[:, 1 * hp:2 * hp])
        o_g = jax.nn.sigmoid(gates[:, 2 * hp:3 * hp])
        out_ref[...] = (o_g * jnp.tanh(i_g * g_g)).astype(out_ref.dtype)


# --------------------------------------------------------------------------------------
# Wrapper
# --------------------------------------------------------------------------------------
def geniepath_layer(x, edge_index, params, *, tile=512):
    """x: [N, in_dim] f32; edge_index: [2, E] int32 (row0 = source, row1 = target)."""
    N, F = x.shape
    H = params["w"].shape[1]

    LANE = 128
    tile = _round_up(tile, LANE)
    H_pad = _round_up(max(H, LANE), LANE)
    F_pad = _round_up(max(F, LANE), LANE)
    N_pad0 = _round_up(N, LANE)
    TQ = TK = min(tile, N_pad0)
    N_pad = _round_up(N, TQ)
    n_row, n_col = N_pad // TQ, N_pad // TK

    # dense adjacency mask (int8, 4x less HBM than f32) with self loops; adj[i, j] = 1
    # iff edge j -> i (PyG GATConv default add_self_loops=True).  Glue only.
    src, dst = edge_index[0], edge_index[1]
    adj = jnp.zeros((N_pad, N_pad), jnp.int8).at[dst, src].set(1)
    diag = jnp.arange(N, dtype=jnp.int32)
    adj = adj.at[diag, diag].set(1)

    # padded / lane-aligned parameters (setup glue)
    x_p = _pad2(x.astype(jnp.float32), N_pad, F_pad)
    w_p = _pad2(params["w"].astype(jnp.float32), F_pad, H_pad)
    a_src = _pad2(params["att_src"].astype(jnp.float32), 1, H_pad)
    a_dst = _pad2(params["att_dst"].astype(jnp.float32), 1, H_pad)
    bias = _pad2(params["gat_bias"].astype(jnp.float32), 1, H_pad)

    # LSTM weight_ih_l0 is [4H, H] with torch gate order i|f|g|o.  The forget gate only
    # multiplies c0 == 0, so keep i|g|o, each transposed into its own lane-aligned
    # H_pad-wide block of a [H_pad, 3*H_pad] matrix (bf16 MXU operand).
    wih = params["weight_ih"].astype(jnp.float32)
    w_i, _w_f, w_g, w_o = jnp.split(wih, 4, axis=0)
    wih_pad = jnp.zeros((H_pad, 3 * H_pad), jnp.float32)
    wih_pad = wih_pad.at[:H, 0 * H_pad:0 * H_pad + H].set(w_i.T)
    wih_pad = wih_pad.at[:H, 1 * H_pad:1 * H_pad + H].set(w_g.T)
    wih_pad = wih_pad.at[:H, 2 * H_pad:2 * H_pad + H].set(w_o.T)
    wih_bf = wih_pad.astype(jnp.bfloat16)

    # ---- prologue: h, s_src, s_dst (row-tiled) ----
    h_bf, s_src_col, s_dst_col = pl.pallas_call(
        project_kernel,
        out_shape=(jax.ShapeDtypeStruct((N_pad, H_pad), jnp.bfloat16),
                   jax.ShapeDtypeStruct((N_pad, 1), jnp.float32),
                   jax.ShapeDtypeStruct((N_pad, 1), jnp.float32)),
        grid=(n_row,),
        in_specs=[pl.BlockSpec((TQ, F_pad), lambda i: (i, 0)),
                  pl.BlockSpec((F_pad, H_pad), lambda i: (0, 0)),
                  pl.BlockSpec((1, H_pad), lambda i: (0, 0)),
                  pl.BlockSpec((1, H_pad), lambda i: (0, 0))],
        out_specs=[pl.BlockSpec((TQ, H_pad), lambda i: (i, 0)),
                   pl.BlockSpec((TQ, 1), lambda i: (i, 0)),
                   pl.BlockSpec((TQ, 1), lambda i: (i, 0))],
        compiler_params=pltpu.CompilerParams(dimension_semantics=("parallel",)),
    )(x_p, w_p, a_src, a_dst)

    s_src_row = s_src_col.T   # [1, N_pad] tiny glue transpose; keeps per-tile broadcast lane-dense

    # ---- main: tiled masked attention + tanh + LSTM step ----
    out_pad = pl.pallas_call(
        attn_lstm_kernel,
        out_shape=jax.ShapeDtypeStruct((N_pad, H_pad), jnp.float32),
        grid=(n_row, n_col),
        in_specs=[
            pl.BlockSpec((TQ, TK), lambda i, j: (i, j)),            # adj tile (int8)
            pl.BlockSpec((TK, H_pad), lambda i, j: (j, 0)),         # source-block h (bf16)
            pl.BlockSpec((TQ, 1), lambda i, j: (i, 0)),             # s_dst
            pl.BlockSpec((1, TK), lambda i, j: (0, j)),             # s_src (row layout)
            pl.BlockSpec((1, H_pad), lambda i, j: (0, 0)),          # GAT bias
            pl.BlockSpec((H_pad, 3 * H_pad), lambda i, j: (0, 0)),  # LSTM gate weights
        ],
        out_specs=pl.BlockSpec((TQ, H_pad), lambda i, j: (i, 0)),
        scratch_shapes=[pltpu.VMEM((TQ, 1), jnp.float32),           # running max m
                        pltpu.VMEM((TQ, 1), jnp.float32),           # running denom l
                        pltpu.VMEM((TQ, H_pad), jnp.float32)],      # un-normalized acc
        compiler_params=pltpu.CompilerParams(
            dimension_semantics=("parallel", "arbitrary")),
    )(adj, h_bf, s_dst_col, s_src_row, bias, wih_bf)

    return out_pad[:N, :H]


# --------------------------------------------------------------------------------------
# Pure-JAX reference (f32) with identical semantics
# --------------------------------------------------------------------------------------
def reference_jax(x, edge_index, params):
    N = x.shape[0]
    src, dst = edge_index[0], edge_index[1]
    adj = jnp.zeros((N, N), jnp.float32).at[dst, src].set(1.0)
    adj = adj.at[jnp.arange(N), jnp.arange(N)].set(1.0)

    h = x @ params["w"]
    s_src = jnp.sum(h * params["att_src"], axis=-1, keepdims=True)
    s_dst = jnp.sum(h * params["att_dst"], axis=-1, keepdims=True)
    e = s_dst + s_src.T
    e = jnp.where(e > 0, e, 0.2 * e)
    logits = jnp.where(adj > 0, e, -1e30)
    p = jnp.exp(logits - jnp.max(logits, axis=-1, keepdims=True)) * adj
    alpha = p / jnp.sum(p, axis=-1, keepdims=True)
    g = jnp.tanh(alpha @ h + params["gat_bias"])

    gates = g @ params["weight_ih"].T          # [N, 4H], torch gate order i|f|g|o
    Hh = g.shape[-1]
    i_g = jax.nn.sigmoid(gates[:, 0 * Hh:1 * Hh])
    f_g = jax.nn.sigmoid(gates[:, 1 * Hh:2 * Hh])
    g_g = jnp.tanh(gates[:, 2 * Hh:3 * Hh])
    o_g = jax.nn.sigmoid(gates[:, 3 * Hh:4 * Hh])
    c = f_g * 0.0 + i_g * g_g                  # c0 == 0
    return o_g * jnp.tanh(c)


def init_params(key, in_dim, hidden):
    k = jax.random.split(key, 5)
    scale = 0.2
    return {
        # GATConv: lin weight [in_dim, hidden], attention vectors [1, hidden], bias [1, hidden]
        "w":        (scale * jax.random.normal(k[0], (in_dim, hidden))).astype(jnp.float32),
        "att_src":  (scale * jax.random.normal(k[1], (1, hidden))).astype(jnp.float32),
        "att_dst":  (scale * jax.random.normal(k[2], (1, hidden))).astype(jnp.float32),
        "gat_bias": (scale * jax.random.normal(k[3], (1, hidden))).astype(jnp.float32),
        # torch.nn.LSTM(bias=False).weight_ih_l0: [4*hidden, hidden], gate order i|f|g|o
        "weight_ih": (scale * jax.random.normal(k[4], (4 * hidden, hidden))).astype(jnp.float32),
        # TODO(synk): weight_hh_l0 omitted — h0 == 0 for a single Depth step so its term is exactly 0.
    }


if __name__ == "__main__":
    key = jax.random.PRNGKey(0)

    # ---- test 1: small deterministic ring graph (single-tile grid) ----
    N, IN_DIM, HIDDEN = 16, 8, 32
    kx, kp, k2 = jax.random.split(key, 3)
    x = jax.random.normal(kx, (N, IN_DIM), dtype=jnp.float32)
    srcs = jnp.arange(N, dtype=jnp.int32)
    dsts = (srcs + 1) % N
    edge_index = jnp.stack([jnp.concatenate([srcs, dsts]),
                            jnp.concatenate([dsts, srcs])], axis=0)   # [2, 2N]
    params = init_params(kp, IN_DIM, HIDDEN)

    out = jax.block_until_ready(geniepath_layer(x, edge_index, params))
    ref = reference_jax(x, edge_index, params)
    assert out.shape == (N, HIDDEN)
    assert jnp.allclose(out, ref, rtol=2e-2, atol=2e-2), "mismatch vs reference (test 1)"

    # ---- test 2: random graph large enough to exercise the (row, col) tiling ----
    N2, IN2, HID2, E2 = 300, 24, 48, 1500
    ka, kb, kc, kd = jax.random.split(k2, 4)
    x2 = jax.random.normal(ka, (N2, IN2), dtype=jnp.float32)
    e_src = jax.random.randint(kb, (E2,), 0, N2, dtype=jnp.int32)
    e_dst = jax.random.randint(kc, (E2,), 0, N2, dtype=jnp.int32)
    edge_index2 = jnp.stack([e_src, e_dst], axis=0)
    params2 = init_params(kd, IN2, HID2)

    out2 = jax.block_until_ready(geniepath_layer(x2, edge_index2, params2, tile=128))
    ref2 = reference_jax(x2, edge_index2, params2)
    assert out2.shape == (N2, HID2)
    assert jnp.allclose(out2, ref2, rtol=2e-2, atol=2e-2), "mismatch vs reference (test 2)"

    print("KERNEL_OK")
</pallas_src>

<mosaic_0001>
module attributes {stable_mosaic.version = 11 : i64} {
  func.func @project_kernel(%arg0: i32, %arg1: memref<128x128xf32, #tpu.memory_space<vmem>>, %arg2: memref<128x128xf32, #tpu.memory_space<vmem>>, %arg3: memref<1x128xf32, #tpu.memory_space<vmem>>, %arg4: memref<1x128xf32, #tpu.memory_space<vmem>>, %arg5: memref<128x128xbf16, #tpu.memory_space<vmem>>, %arg6: memref<128x1xf32, #tpu.memory_space<vmem>>, %arg7: memref<128x1xf32, #tpu.memory_space<vmem>>) attributes {dimension_semantics = [#tpu.dimension_semantics<parallel>], iteration_bounds = array<i64: 1>, scalar_prefetch = 0 : i64, scratch_operands = 0 : i64, tpu.core_type = #tpu.core_type<tc>, window_params = [{transform_indices = @transform_0, window_bounds = array<i64: 128, 128>}, {pipeline_mode = #tpu.pipeline_mode<synchronous>, transform_indices = @transform_1, window_bounds = array<i64: 128, 128>}, {pipeline_mode = #tpu.pipeline_mode<synchronous>, transform_indices = @transform_2, window_bounds = array<i64: 1, 128>}, {pipeline_mode = #tpu.pipeline_mode<synchronous>, transform_indices = @transform_3, window_bounds = array<i64: 1, 128>}, {transform_indices = @transform_4, window_bounds = array<i64: 128, 128>}, {transform_indices = @transform_5, window_bounds = array<i64: 128, 1>}, {transform_indices = @transform_6, window_bounds = array<i64: 128, 1>}]} {
    %c0 = arith.constant 0 : index
    %c0_0 = arith.constant 0 : index
    %0 = vector.load %arg1[%c0, %c0_0] : memref<128x128xf32, #tpu.memory_space<vmem>>, vector<128x128xf32>
    %c0_1 = arith.constant 0 : index
    %c0_2 = arith.constant 0 : index
    %1 = vector.load %arg2[%c0_1, %c0_2] : memref<128x128xf32, #tpu.memory_space<vmem>>, vector<128x128xf32>
    %cst = arith.constant dense<0.000000e+00> : vector<128x128xf32>
    %2 = tpu.matmul %0, %1, %cst {dimension_numbers = #tpu.dot_dimension_numbers<[1], [0], [0], [1], [0, 0, 1, 1], [], []>} : vector<128x128xf32>, vector<128x128xf32>, vector<128x128xf32> -> vector<128x128xf32>
    %c0_3 = arith.constant 0 : index
    %c0_4 = arith.constant 0 : index
    %3 = vector.load %arg3[%c0_3, %c0_4] : memref<1x128xf32, #tpu.memory_space<vmem>>, vector<1x128xf32>
    %4 = vector.broadcast %3 : vector<1x128xf32> to vector<128x128xf32>
    %5 = arith.mulf %2, %4 : vector<128x128xf32>
    %cst_5 = arith.constant dense<0.000000e+00> : vector<128xf32>
    %6 = vector.multi_reduction <add>, %5, %cst_5 [1] : vector<128x128xf32> to vector<128xf32>
    %7 = vector.shape_cast %6 : vector<128xf32> to vector<128x1xf32>
    %c0_6 = arith.constant 0 : index
    %c0_7 = arith.constant 0 : index
    %8 = vector.load %arg6[%c0_6, %c0_7] : memref<128x1xf32, #tpu.memory_space<vmem>>, vector<128x1xf32>
    tpu.vector_store %arg6[%c0_6, %c0_7], %7 {strides = array<i32>} : memref<128x1xf32, #tpu.memory_space<vmem>>, vector<128x1xf32>,
    %c0_8 = arith.constant 0 : index
    %c0_9 = arith.constant 0 : index
    %9 = vector.load %arg4[%c0_8, %c0_9] : memref<1x128xf32, #tpu.memory_space<vmem>>, vector<1x128xf32>
    %10 = vector.broadcast %9 : vector<1x128xf32> to vector<128x128xf32>
    %11 = arith.mulf %2, %10 : vector<128x128xf32>
    %cst_10 = arith.constant dense<0.000000e+00> : vector<128xf32>
    %12 = vector.multi_reduction <add>, %11, %cst_10 [1] : vector<128x128xf32> to vector<128xf32>
    %13 = vector.shape_cast %12 : vector<128xf32> to vector<128x1xf32>
    %c0_11 = arith.constant 0 : index
    %c0_12 = arith.constant 0 : index
    %14 = vector.load %arg7[%c0_11, %c0_12] : memref<128x1xf32, #tpu.memory_space<vmem>>, vector<128x1xf32>
    tpu.vector_store %arg7[%c0_11, %c0_12], %13 {strides = array<i32>} : memref<128x1xf32, #tpu.memory_space<vmem>>, vector<128x1xf32>,
    %15 = arith.truncf %2 : vector<128x128xf32> to vector<128x128xbf16>
    %c0_13 = arith.constant 0 : index
    %c0_14 = arith.constant 0 : index
    %16 = vector.load %arg5[%c0_13, %c0_14] : memref<128x128xbf16, #tpu.memory_space<vmem>>, vector<128x128xbf16>
    tpu.vector_store %arg5[%c0_13, %c0_14], %15 {strides = array<i32>} : memref<128x128xbf16, #tpu.memory_space<vmem>>, vector<128x128xbf16>,
    return
  }
  func.func @transform_0(%arg0: i32) -> (i32, i32) {
    %c0_i32 = arith.constant 0 : i32
    %c0_i32_0 = arith.constant 0 : i32
    return %arg0, %c0_i32 : i32, i32
  }
  func.func @transform_1(%arg0: i32) -> (i32, i32) {
    %c0_i32 = arith.constant 0 : i32
    %c0_i32_0 = arith.constant 0 : i32
    %c0_i32_1 = arith.constant 0 : i32
    return %c0_i32, %c0_i32_0 : i32, i32
  }
  func.func @transform_2(%arg0: i32) -> (i32, i32) {
    %c0_i32 = arith.constant 0 : i32
    %c0_i32_0 = arith.constant 0 : i32
    %c0_i32_1 = arith.constant 0 : i32
    return %c0_i32, %c0_i32_0 : i32, i32
  }
  func.func @transform_3(%arg0: i32) -> (i32, i32) {
    %c0_i32 = arith.constant 0 : i32
    %c0_i32_0 = arith.constant 0 : i32
    %c0_i32_1 = arith.constant 0 : i32
    return %c0_i32, %c0_i32_0 : i32, i32
  }
  func.func @transform_4(%arg0: i32) -> (i32, i32) {
    %c0_i32 = arith.constant 0 : i32
    %c0_i32_0 = arith.constant 0 : i32
    return %arg0, %c0_i32 : i32, i32
  }
  func.func @transform_5(%arg0: i32) -> (i32, i32) {
    %c0_i32 = arith.constant 0 : i32
    %c0_i32_0 = arith.constant 0 : i32
    return %arg0, %c0_i32 : i32, i32
  }
  func.func @transform_6(%arg0: i32) -> (i32, i32) {
    %c0_i32 = arith.constant 0 : i32
    %c0_i32_0 = arith.constant 0 : i32
    return %arg0, %c0_i32 : i32, i32
  }
}

</mosaic_0001>

<bundles_post_ra>
// kernel: tpu_custom_call.1
= control target key start
LH: loop header
LB: loop body
LE: loop exit
PB: predicated region body
PF: predicated region fallthrough
CT: control target
= control target key end

     0   :  { %12 = vsyncpa [#allocation3], 0  ;;  %s1019_s0 = inlined_call_operand.hbm [shape: f32[128,128], index: 0, kind: input, shape index: {}]   ;;  %s1020_s1 = inlined_call_operand.hbm [shape: f32[128,128], index: 1, kind: input, shape index: {}]   ;;  %s1021_s2 = inlined_call_operand.vmem [shape: f32[1,128], index: 2, kind: input, shape index: {}]   ;;  %s1022_s3 = inlined_call_operand.vmem [shape: f32[1,128], index: 3, kind: input, shape index: {}]   ;;  %s1023_s4 = inlined_call_operand.hbm [shape: bf16[128,128], index: 4, kind: output, shape index: {0}]   ;;  %s1024_s5 = inlined_call_operand.vmem [shape: f32[128,1], index: 5, kind: output, shape index: {1}]   ;;  %s1025_s6 = inlined_call_operand.vmem [shape: f32[128,1], index: 6, kind: output, shape index: {2}]  }
   0x1   :  { %13 = vsyncpa [#allocation6], 0 }
   0x2   :  { %14 = vsyncpa [#allocation4], 0  ;;  %s771_s21 = smov [#allocation2]   ;;  %s699_s25 = scalar_lea.hbm %s1019_s0, 2048 }
   0x3   :  { %s20_s22 = sshll.u32 %s771_s21, 4  ;;  %p700_p0 = scmp.ne.s32.totalorder %s1019_s0, %s699_s25  ;;  %s21_s22 = int_to_ptr.vmem [resolvable:$true] %s20_s22 }
   0x4   :  { %p703_p1 = scmp.lt.u32.totalorder %s699_s25, %s1019_s0 }
   0x6   :  { %p705_p2 = pnand %p703_p1, %p700_p0 }
   0x8   :  { %708 = shalt.err (!%p705_p2)
}
   0x9   :  { %s709_s30 = scalar_lea.vmem %s21_s22, 2048  ;;  %p714_p4 = scmp.lt.s32.totalorder %s21_s22, %s21_s22 }
   0xa   :  { %p710_p3 = scmp.ne.s32.totalorder %s21_s22, %s709_s30  ;;  %p715_p5 = scmp.lt.s32.totalorder %s709_s30, %s709_s30 }
   0xc   :  { %p716_p6 = por %p715_p5, %p714_p4 }
   0xe   :  { %p717_p7 = pnand %p716_p6, %p710_p3 }
  0x10   :  { %720 = shalt.err (!%p717_p7)
}
  0x11   :  { %s772_s7 = smov 128   ;;  %s773_s8 = smov 8  }
  0x12   :  { %26 = dma.hbm_to_vmem [thread:$0]  %s1019_s0, 2048, %s21_s22, [#allocation3], %s772_s7, %s772_s7, %s773_s8  }
  0x13   :  { %s774_s11 = smov [#allocation5]   ;;  %s721_s15 = scalar_lea.hbm %s1020_s1, 2048 }
  0x14   :  { %s32_s12 = sshll.u32 %s774_s11, 4  ;;  %p722_p8 = scmp.ne.s32.totalorder %s1020_s1, %s721_s15  ;;  %s33_s12 = int_to_ptr.vmem [resolvable:$true] %s32_s12 }
  0x15   :  { %p725_p9 = scmp.lt.u32.totalorder %s721_s15, %s1020_s1 }
  0x17   :  { %p727_p10 = pnand %p725_p9, %p722_p8 }
  0x19   :  { %730 = shalt.err (!%p727_p10)
}
  0x1a   :  { %s731_s20 = scalar_lea.vmem %s33_s12, 2048  ;;  %p736_p12 = scmp.lt.s32.totalorder %s33_s12, %s33_s12 }
  0x1b   :  { %p732_p11 = scmp.ne.s32.totalorder %s33_s12, %s731_s20  ;;  %p737_p13 = scmp.lt.s32.totalorder %s731_s20, %s731_s20 }
  0x1d   :  { %p738_p0 = por %p737_p13, %p736_p12 }
  0x1f   :  { %p739_p1 = pnand %p738_p0, %p732_p11 }
  0x21   :  { %742 = shalt.err (!%p739_p1)
}
  0x22   :  { %38 = dma.hbm_to_vmem [thread:$0]  %s1020_s1, 2048, %s33_s12, [#allocation6], %s772_s7, %s772_s7, %s773_s8  }
  0x23   :  { %765 = dma.done.wait [#allocation3], 2048  }
  0x24   :  { %766 = vsyncadd [#allocation3], 4294965248 }
  0x25   :  { %767 = dma.done.wait [#allocation6], 2048  }
  0x26   :  { %768 = vsyncadd [#allocation6], 4294965248  ;;  %v65_v0 = vld [vmem:[#allocation5] sm:$0xff]  ;;  %v66_v1 = vld [vmem:[#allocation5 + $0x8] sm:$0xff] }
  0x27   :  { %v67_v2 = vld [vmem:[#allocation5 + $0x10] sm:$0xff]  ;;  %v644_v3 = vpack.c.bf16 %v66_v1, %v65_v0  ;;  %v68_v4 = vld [vmem:[#allocation5 + $0x18] sm:$0xff]  ;;  %v69_v6 = vld [vmem:[#allocation5 + $0x20] sm:$0xff] }
  0x28   :  { %v648_v5 = vpack.c.bf16 %v68_v4, %v67_v2  ;;  %v70_v7 = vld [vmem:[#allocation5 + $0x28] sm:$0xff]  ;;  %v49_v9 = vld [vmem:[#allocation2] sm:$0xff]  ;;  %v71_v11 = vld [vmem:[#allocation5 + $0x30] sm:$0xff] }
  0x29   :  { %645 = vmatprep.subr.bf16.mxu0 %v644_v3  ;;  %676 = vmatprep.subr.bf16.mxu1 %v644_v3  ;;  %v652_v8 = vpack.c.bf16 %v70_v7, %v69_v6  ;;  %v57_v10 = vld [vmem:[#allocation2 + $0x40] sm:$0xff]  ;;  %v72_v12 = vld [vmem:[#allocation5 + $0x38] sm:$0xff]  ;;  %v74_v15 = vld [vmem:[#allocation5 + $0x48] sm:$0xff] }
  0x2a   :  { %647 = vmatpush3.bf16.msra.mxu0 %v644_v3  ;;  %684 = vmatpush3.bf16.msra.mxu1 %v644_v3  ;;  %v656_v13 = vpack.c.bf16 %v72_v12, %v71_v11  ;;  %v73_v14 = vld [vmem:[#allocation5 + $0x40] sm:$0xff]  ;;  %v75_v17 = vld [vmem:[#allocation5 + $0x50] sm:$0xff]  ;;  %v76_v18 = vld [vmem:[#allocation5 + $0x58] sm:$0xff] }
  0x2b   :  { %649 = vmatprep.subr.bf16.mxu0 %v648_v5  ;;  %677 = vmatprep.subr.bf16.mxu1 %v648_v5  ;;  %v660_v16 = vpack.c.bf16 %v74_v15, %v73_v14  ;;  %v664_v19 = vpack.c.bf16 %v76_v18, %v75_v17  ;;  %v77_v20 = vld [vmem:[#allocation5 + $0x60] sm:$0xff]  ;;  %v78_v21 = vld [vmem:[#allocation5 + $0x68] sm:$0xff]  ;;  %v79_v23 = vld [vmem:[#allocation5 + $0x70] sm:$0xff] }
  0x2c   :  { %620 = vmatprep.mubr.f32.mxu0 %v49_v9  ;;  %632 = vmatprep.mubr.f32.mxu1 %v57_v10  ;;  %v668_v22 = vpack.c.bf16 %v78_v21, %v77_v20  ;;  %v80_v24 = vld [vmem:[#allocation5 + $0x78] sm:$0xff]  ;;  %v50_v26 = vld [vmem:[#allocation2 + $0x8] sm:$0xff]  ;;  %v51_v28 = vld [vmem:[#allocation2 + $0x10] sm:$0xff] }
  0x2d   :  { %v672_v25 = vpack.c.bf16 %v80_v24, %v79_v23  ;;  %v58_v27 = vld [vmem:[#allocation2 + $0x48] sm:$0xff]  ;;  %v59_v29 = vld [vmem:[#allocation2 + $0x50] sm:$0xff]  ;;  %v52_v30 = vld [vmem:[#allocation2 + $0x18] sm:$0xff] }
  0x2e   :  { %651 = vmatpush3.bf16.msra.mxu0 %v648_v5  ;;  %685 = vmatpush3.bf16.msra.mxu1 %v648_v5  ;;  %v60_v31 = vld [vmem:[#allocation2 + $0x58] sm:$0xff]  ;;  %v53_v32 = vld [vmem:[#allocation2 + $0x20] sm:$0xff]  ;;  %v54_v34 = vld [vmem:[#allocation2 + $0x28] sm:$0xff] }
  0x2f   :  { %653 = vmatprep.subr.bf16.mxu0 %v652_v8  ;;  %678 = vmatprep.subr.bf16.mxu1 %v652_v8  ;;  %v61_v33 = vld [vmem:[#allocation2 + $0x60] sm:$0xff]  ;;  %v62_v35 = vld [vmem:[#allocation2 + $0x68] sm:$0xff]  ;;  %v55_v36 = vld [vmem:[#allocation2 + $0x30] sm:$0xff] }
  0x30   :  { %v63_v37 = vld [vmem:[#allocation2 + $0x70] sm:$0xff]  ;;  %v56_v38 = vld [vmem:[#allocation2 + $0x38] sm:$0xff]  ;;  %v840_v40 = vld [vmem:[%s1021_s2] ss:$0 sm:$0xff]  ;;  %s775_s2 = smov [#allocation7]  }
  0x31   :  { %v64_v39 = vld [vmem:[#allocation2 + $0x78] sm:$0xff]  ;;  %v847_v49 = vld [vmem:[%s1022_s3] ss:$0 sm:$0xff]  ;;  %s454_s3 = sshll.u32 %s775_s2, 4  ;;  %s455_s3 = int_to_ptr.vmem [resolvable:$true] %s454_s3 }
  0x32   :  { %655 = vmatpush3.bf16.msra.mxu0 %v652_v8  ;;  %686 = vmatpush3.bf16.msra.mxu1 %v652_v8  ;;  %s743_s25 = scalar_lea.vmem %s455_s3, 1024  ;;  %p748_p3 = scmp.lt.s32.totalorder %s455_s3, %s455_s3 }
  0x33   :  { %657 = vmatprep.subr.bf16.mxu0 %v656_v13  ;;  %679 = vmatprep.subr.bf16.mxu1 %v656_v13  ;;  %p744_p2 = scmp.ne.s32.totalorder %s455_s3, %s743_s25  ;;  %p749_p4 = scmp.lt.s32.totalorder %s743_s25, %s743_s25 }
  0x35   :  { %p750_p5 = por %p749_p4, %p748_p3 }
  0x36   :  { %659 = vmatpush3.bf16.msra.mxu0 %v656_v13  ;;  %687 = vmatpush3.bf16.msra.mxu1 %v656_v13 }
  0x37   :  { %661 = vmatprep.subr.bf16.mxu0 %v660_v16  ;;  %680 = vmatprep.subr.bf16.mxu1 %v660_v16  ;;  %p751_p6 = pnand %p750_p5, %p744_p2 }
  0x3a   :  { %663 = vmatpush3.bf16.msra.mxu0 %v660_v16  ;;  %688 = vmatpush3.bf16.msra.mxu1 %v660_v16 }
  0x3b   :  { %665 = vmatprep.subr.bf16.mxu0 %v664_v19  ;;  %681 = vmatprep.subr.bf16.mxu1 %v664_v19 }
  0x3e   :  { %667 = vmatpush3.bf16.msra.mxu0 %v664_v19  ;;  %689 = vmatpush3.bf16.msra.mxu1 %v664_v19 }
  0x3f   :  { %669 = vmatprep.subr.bf16.mxu0 %v668_v22  ;;  %682 = vmatprep.subr.bf16.mxu1 %v668_v22 }
  0x42   :  { %671 = vmatpush3.bf16.msra.mxu0 %v668_v22  ;;  %690 = vmatpush3.bf16.msra.mxu1 %v668_v22 }
  0x43   :  { %673 = vmatprep.subr.bf16.mxu0 %v672_v25  ;;  %683 = vmatprep.subr.bf16.mxu1 %v672_v25 }
  0x46   :  { %675 = vmatpush3.bf16.msra.mxu0 %v672_v25  ;;  %691 = vmatpush3.bf16.msra.mxu1 %v672_v25 }
  0x49   :  { %621 = vmatmul.mubr.f32.vlgmr.msra.gmra.mrb[0].mxu0 %v50_v26  ;;  %633 = vmatmul.mubr.f32.vlgmr.msra.gmra.mrb[0].mxu1 %v58_v27 }
  0x4a   :  { %623 = vmatprep.mubr.f32.mxu0 %v51_v28  ;;  %635 = vmatprep.mubr.f32.mxu1 %v59_v29 }
  0x4d   :  { %624 = vmatmul.mubr.f32.gmra.mrb[2].mxu0 %v52_v30  ;;  %636 = vmatmul.mubr.f32.gmra.mrb[2].mxu1 %v60_v31 }
  0x4e   :  { %626 = vmatprep.mubr.f32.mxu0 %v53_v32  ;;  %638 = vmatprep.mubr.f32.mxu1 %v61_v33 }
  0x51   :  { %627 = vmatmul.mubr.f32.gmra.mrb[4].mxu0 %v54_v34  ;;  %639 = vmatmul.mubr.f32.gmra.mrb[4].mxu1 %v62_v35 }
  0x52   :  { %629 = vmatprep.mubr.f32.mxu0 %v55_v36  ;;  %641 = vmatprep.mubr.f32.mxu1 %v63_v37 }
  0x55   :  { %630 = vmatmul.mubr.f32.gmra.mrb[6].mxu0 %v56_v38  ;;  %642 = vmatmul.mubr.f32.gmra.mrb[6].mxu1 %v64_v39 }
 0x11c   :  { %v622_v41 = vpop.f32.mrb[0].mxu0  ;;  %v634_v42 = vpop.f32.mrb[0].mxu1 }
 0x11d   :  { %v147_v43 = vpop.f32.mrb[1].mxu0  ;;  %v187_v44 = vpop.f32.mrb[1].mxu1  ;;  %v242_v45 = vmul.f32 %v634_v42, %v840_v40  ;;  %v234_v46 = vmul.f32 %v622_v41, %v840_v40  ;;  %v306_v52 = vmul.f32 %v622_v41, %v847_v49  ;;  %v314_v60 = vmul.f32 %v634_v42, %v847_v49 }
 0x11e   :  { %v512_v47 = vpack.c.bf16 %v622_v41, %v147_v43  ;;  %v532_v48 = vpack.c.bf16 %v634_v42, %v187_v44  ;;  %v233_v53 = vmul.f32 %v840_v40, %v147_v43  ;;  %v241_v61 = vmul.f32 %v840_v40, %v187_v44 }
 0x11f   :  { %267 = vadd.xlane.f32.xlu1 %v242_v45  ;;  %251 = vadd.xlane.f32.xlu0 %v234_v46  ;;  %v305_v5 = vmul.f32 %v847_v49, %v147_v43  ;;  %v313_v11 = vmul.f32 %v847_v49, %v187_v44 }
 0x120   :  { %513 = vst [vmem:[#allocation7] sm:$0xff] %v512_v47   ;;  %552 = vst [vmem:[#allocation7 + $0x20] sm:$0xff] %v532_v48   ;;  %v625_v50 = vpop.f32.mrb[2].mxu0  ;;  %v637_v51 = vpop.f32.mrb[2].mxu1 }
 0x121   :  { %v157_v54 = vpop.f32.mrb[3].mxu0  ;;  %v197_v55 = vpop.f32.mrb[3].mxu1  ;;  %v236_v2 = vmul.f32 %v625_v50, %v840_v40  ;;  %v244_v10 = vmul.f32 %v637_v51, %v840_v40  ;;  %v308_v13 = vmul.f32 %v625_v50, %v847_v49  ;;  %v316_v14 = vmul.f32 %v637_v51, %v847_v49 }
 0x122   :  { %v517_v56 = vpack.c.bf16 %v625_v50, %v157_v54  ;;  %v537_v57 = vpack.c.bf16 %v637_v51, %v197_v55  ;;  %v243_v12 = vmul.f32 %v840_v40, %v197_v55  ;;  %v307_v15 = vmul.f32 %v847_v49, %v157_v54 }
 0x123   :  { %323 = vadd.xlane.f32.xlu1 %v306_v52  ;;  %249 = vadd.xlane.f32.xlu0 %v233_v53  ;;  %v315_v16 = vmul.f32 %v847_v49, %v197_v55  ;;  %v235_v17 = vmul.f32 %v840_v40, %v157_v54 }
 0x124   :  { %549 = vst [vmem:[#allocation7 + $0x8] sm:$0xff] %v517_v56   ;;  %553 = vst [vmem:[#allocation7 + $0x28] sm:$0xff] %v537_v57   ;;  %v628_v58 = vpop.f32.mrb[4].mxu0  ;;  %v640_v59 = vpop.f32.mrb[4].mxu1 }
 0x125   :  { %v167_v62 = vpop.f32.mrb[5].mxu0  ;;  %v207_v63 = vpop.f32.mrb[5].mxu1  ;;  %v238_v18 = vmul.f32 %v628_v58, %v840_v40  ;;  %v246_v20 = vmul.f32 %v640_v59, %v840_v40  ;;  %v310_v22 = vmul.f32 %v628_v58, %v847_v49  ;;  %v318_v24 = vmul.f32 %v640_v59, %v847_v49 }
 0x126   :  { %v522_v0 = vpack.c.bf16 %v628_v58, %v167_v62  ;;  %v542_v1 = vpack.c.bf16 %v640_v59, %v207_v63  ;;  %v237_v19 = vmul.f32 %v840_v40, %v167_v62  ;;  %v245_v21 = vmul.f32 %v840_v40, %v207_v63 }
 0x127   :  { %339 = vadd.xlane.f32.xlu1 %v314_v60  ;;  %265 = vadd.xlane.f32.xlu0 %v241_v61  ;;  %v309_v23 = vmul.f32 %v847_v49, %v167_v62  ;;  %v317_v25 = vmul.f32 %v847_v49, %v207_v63 }
 0x128   :  { %550 = vst [vmem:[#allocation7 + $0x10] sm:$0xff] %v522_v0   ;;  %554 = vst [vmem:[#allocation7 + $0x30] sm:$0xff] %v542_v1   ;;  %v631_v3 = vpop.f32.mrb[6].mxu0  ;;  %v643_v4 = vpop.f32.mrb[6].mxu1 }
 0x129   :  { %v177_v6 = vpop.f32.mrb[7].mxu0  ;;  %v217_v7 = vpop.f32.mrb[7].mxu1  ;;  %v240_v26 = vmul.f32 %v631_v3, %v840_v40  ;;  %v248_v28 = vmul.f32 %v643_v4, %v840_v40  ;;  %v312_v30 = vmul.f32 %v631_v3, %v847_v49  ;;  %v320_v32 = vmul.f32 %v643_v4, %v847_v49 }
 0x12a   :  { %v527_v8 = vpack.c.bf16 %v631_v3, %v177_v6  ;;  %v547_v9 = vpack.c.bf16 %v643_v4, %v217_v7  ;;  %v239_v27 = vmul.f32 %v840_v40, %v177_v6  ;;  %v247_v29 = vmul.f32 %v840_v40, %v217_v7 }
 0x12b   :  { %321 = vadd.xlane.f32.xlu0 %v305_v5  ;;  %255 = vadd.xlane.f32.xlu1 %v236_v2  ;;  %v311_v31 = vmul.f32 %v847_v49, %v177_v6  ;;  %v319_v33 = vmul.f32 %v847_v49, %v217_v7 }
 0x12c   :  { %551 = vst [vmem:[#allocation7 + $0x18] sm:$0xff] %v527_v8   ;;  %555 = vst [vmem:[#allocation7 + $0x38] sm:$0xff] %v547_v9  }
 0x12f   :  { %337 = vadd.xlane.f32.xlu0 %v313_v11  ;;  %271 = vadd.xlane.f32.xlu1 %v244_v10 }
 0x133   :  { %269 = vadd.xlane.f32.xlu0 %v243_v12  ;;  %327 = vadd.xlane.f32.xlu1 %v308_v13 }
 0x137   :  { %343 = vadd.xlane.f32.xlu1 %v316_v14  ;;  %325 = vadd.xlane.f32.xlu0 %v307_v15 }
 0x13b   :  { %341 = vadd.xlane.f32.xlu0 %v315_v16  ;;  %253 = vadd.xlane.f32.xlu1 %v235_v17 }
 0x13f   :  { %259 = vadd.xlane.f32.xlu1 %v238_v18  ;;  %257 = vadd.xlane.f32.xlu0 %v237_v19 }
 0x143   :  { %275 = vadd.xlane.f32.xlu1 %v246_v20  ;;  %273 = vadd.xlane.f32.xlu0 %v245_v21 }
 0x147   :  { %331 = vadd.xlane.f32.xlu1 %v310_v22  ;;  %329 = vadd.xlane.f32.xlu0 %v309_v23 }
 0x14b   :  { %347 = vadd.xlane.f32.xlu1 %v318_v24  ;;  %345 = vadd.xlane.f32.xlu0 %v317_v25 }
 0x14f   :  { %263 = vadd.xlane.f32.xlu1 %v240_v26  ;;  %261 = vadd.xlane.f32.xlu0 %v239_v27 }
 0x153   :  { %279 = vadd.xlane.f32.xlu1 %v248_v28  ;;  %277 = vadd.xlane.f32.xlu0 %v247_v29 }
 0x157   :  { %335 = vadd.xlane.f32.xlu1 %v312_v30  ;;  %333 = vadd.xlane.f32.xlu0 %v311_v31 }
 0x15b   :  { %351 = vadd.xlane.f32.xlu1 %v320_v32  ;;  %349 = vadd.xlane.f32.xlu0 %v319_v33 }
 0x15c   :  { %754 = shalt.err (!%p751_p6)
}
 0x15d   :  { %s755_s28 = scalar_lea.hbm %s1023_s4, 1024 }
 0x15e   :  { %p756_p7 = scmp.ne.s32.totalorder %s1023_s4, %s755_s28  ;;  %p759_p8 = scmp.lt.u32.totalorder %s755_s28, %s1023_s4 }
 0x160   :  { %p761_p9 = pnand %p759_p8, %p756_p7 }
 0x162   :  { %764 = shalt.err (!%p761_p9)
}
 0x163   :  { %s776_s9 = smov 64   ;;  %s777_s10 = smov 4   ;;  %vm281_vm0 = vcmask 7168  }
 0x164   :  { %460 = dma.vmem_to_hbm [thread:$0]  %s455_s3, 1024, %s1023_s4, [#allocation4], %s776_s9, %s776_s9, %s777_s10  }
 0x1ac   :  { %v268_v34 = vpop.xlane.xlu1 %267  ;;  %v252_v35 = vpop.xlane.xlu0 %251 }
 0x1ad   :  { %291 = vst.msk [vmem:[%s1024_s5 + $0x48] sm:$0xff] %vm281_vm0, %v268_v34  ;;  %283 = vst.msk [vmem:[%s1024_s5 + $0x8] sm:$0xff] %vm281_vm0, %v252_v35 }
 0x1b0   :  { %v324_v36 = vpop.xlane.xlu1 %323  ;;  %v250_v37 = vpop.xlane.xlu0 %249 }
 0x1b1   :  { %354 = vst.msk [vmem:[%s1025_s6 + $0x8] sm:$0xff] %vm281_vm0, %v324_v36  ;;  %282 = vst.msk [vmem:[%s1024_s5] sm:$0xff] %vm281_vm0, %v250_v37 }
 0x1b4   :  { %v340_v38 = vpop.xlane.xlu1 %339  ;;  %v266_v39 = vpop.xlane.xlu0 %265 }
 0x1b5   :  { %362 = vst.msk [vmem:[%s1025_s6 + $0x48] sm:$0xff] %vm281_vm0, %v340_v38  ;;  %290 = vst.msk [vmem:[%s1024_s5 + $0x40] sm:$0xff] %vm281_vm0, %v266_v39 }
 0x1b8   :  { %v322_v40 = vpop.xlane.xlu0 %321  ;;  %v256_v41 = vpop.xlane.xlu1 %255 }
 0x1b9   :  { %353 = vst.msk [vmem:[%s1025_s6] sm:$0xff] %vm281_vm0, %v322_v40  ;;  %285 = vst.msk [vmem:[%s1024_s5 + $0x18] sm:$0xff] %vm281_vm0, %v256_v41 }
 0x1bc   :  { %v338_v42 = vpop.xlane.xlu0 %337  ;;  %v272_v43 = vpop.xlane.xlu1 %271 }
 0x1bd   :  { %361 = vst.msk [vmem:[%s1025_s6 + $0x40] sm:$0xff] %vm281_vm0, %v338_v42  ;;  %293 = vst.msk [vmem:[%s1024_s5 + $0x58] sm:$0xff] %vm281_vm0, %v272_v43 }
 0x1c0   :  { %v270_v44 = vpop.xlane.xlu0 %269  ;;  %v328_v45 = vpop.xlane.xlu1 %327 }
 0x1c1   :  { %292 = vst.msk [vmem:[%s1024_s5 + $0x50] sm:$0xff] %vm281_vm0, %v270_v44  ;;  %356 = vst.msk [vmem:[%s1025_s6 + $0x18] sm:$0xff] %vm281_vm0, %v328_v45 }
 0x1c4   :  { %v344_v46 = vpop.xlane.xlu1 %343  ;;  %v326_v47 = vpop.xlane.xlu0 %325 }
 0x1c5   :  { %364 = vst.msk [vmem:[%s1025_s6 + $0x58] sm:$0xff] %vm281_vm0, %v344_v46  ;;  %355 = vst.msk [vmem:[%s1025_s6 + $0x10] sm:$0xff] %vm281_vm0, %v326_v47 }
 0x1c8   :  { %v342_v48 = vpop.xlane.xlu0 %341  ;;  %v254_v49 = vpop.xlane.xlu1 %253 }
 0x1c9   :  { %363 = vst.msk [vmem:[%s1025_s6 + $0x50] sm:$0xff] %vm281_vm0, %v342_v48  ;;  %284 = vst.msk [vmem:[%s1024_s5 + $0x10] sm:$0xff] %vm281_vm0, %v254_v49 }
 0x1cc   :  { %v260_v50 = vpop.xlane.xlu1 %259  ;;  %v258_v51 = vpop.xlane.xlu0 %257 }
 0x1cd   :  { %287 = vst.msk [vmem:[%s1024_s5 + $0x28] sm:$0xff] %vm281_vm0, %v260_v50  ;;  %286 = vst.msk [vmem:[%s1024_s5 + $0x20] sm:$0xff] %vm281_vm0, %v258_v51 }
 0x1d0   :  { %v276_v52 = vpop.xlane.xlu1 %275  ;;  %v274_v53 = vpop.xlane.xlu0 %273 }
 0x1d1   :  { %295 = vst.msk [vmem:[%s1024_s5 + $0x68] sm:$0xff] %vm281_vm0, %v276_v52  ;;  %294 = vst.msk [vmem:[%s1024_s5 + $0x60] sm:$0xff] %vm281_vm0, %v274_v53 }
 0x1d4   :  { %v332_v54 = vpop.xlane.xlu1 %331  ;;  %v330_v55 = vpop.xlane.xlu0 %329 }
 0x1d5   :  { %358 = vst.msk [vmem:[%s1025_s6 + $0x28] sm:$0xff] %vm281_vm0, %v332_v54  ;;  %357 = vst.msk [vmem:[%s1025_s6 + $0x20] sm:$0xff] %vm281_vm0, %v330_v55 }
 0x1d8   :  { %v348_v56 = vpop.xlane.xlu1 %347  ;;  %v346_v57 = vpop.xlane.xlu0 %345 }
 0x1d9   :  { %366 = vst.msk [vmem:[%s1025_s6 + $0x68] sm:$0xff] %vm281_vm0, %v348_v56  ;;  %365 = vst.msk [vmem:[%s1025_s6 + $0x60] sm:$0xff] %vm281_vm0, %v346_v57 }
 0x1dc   :  { %v264_v58 = vpop.xlane.xlu1 %263  ;;  %v262_v59 = vpop.xlane.xlu0 %261 }
 0x1dd   :  { %289 = vst.msk [vmem:[%s1024_s5 + $0x38] sm:$0xff] %vm281_vm0, %v264_v58  ;;  %288 = vst.msk [vmem:[%s1024_s5 + $0x30] sm:$0xff] %vm281_vm0, %v262_v59 }
 0x1e0   :  { %v280_v60 = vpop.xlane.xlu1 %279  ;;  %v278_v61 = vpop.xlane.xlu0 %277 }
 0x1e1   :  { %297 = vst.msk [vmem:[%s1024_s5 + $0x78] sm:$0xff] %vm281_vm0, %v280_v60  ;;  %296 = vst.msk [vmem:[%s1024_s5 + $0x70] sm:$0xff] %vm281_vm0, %v278_v61 }
 0x1e4   :  { %v336_v62 = vpop.xlane.xlu1 %335  ;;  %v334_v63 = vpop.xlane.xlu0 %333 }
 0x1e5   :  { %360 = vst.msk [vmem:[%s1025_s6 + $0x38] sm:$0xff] %vm281_vm0, %v336_v62  ;;  %359 = vst.msk [vmem:[%s1025_s6 + $0x30] sm:$0xff] %vm281_vm0, %v334_v63 }
 0x1e8   :  { %v352_v0 = vpop.xlane.xlu1 %351  ;;  %v350_v1 = vpop.xlane.xlu0 %349 }
 0x1e9   :  { %368 = vst.msk [vmem:[%s1025_s6 + $0x78] sm:$0xff] %vm281_vm0, %v352_v0  ;;  %367 = vst.msk [vmem:[%s1025_s6 + $0x70] sm:$0xff] %vm281_vm0, %v350_v1 }
 0x1ea   :  { %769 = dma.done.wait [#allocation4], 1024  }
 0x1eb   :  { %770 = vsyncadd [#allocation4], 4294966272 }
 0x1ec   :  { %472 = vsyncpa [#allocation3], 1 }
 0x1ed   :  { %473 = vsyncpa [#allocation6], 1 }
 0x1ee   :  { %474 = vsyncpa [#allocation4], 1 }

</bundles_post_ra>
